<compile_context>
chip_gen: v5e
topology: v5e:2x2
jax: 0.10.0
libtpu: 0.0.40
codegen_flags: <defaults>
</compile_context>

<pallas_src>
import functools

import jax
import jax.numpy as jnp
from jax.experimental import pallas as pl
from jax.experimental.pallas import tpu as pltpu


# ----------------------------------------------------------------------------
# Kernel body: tiled matmul with f32 accumulator scratch
# ----------------------------------------------------------------------------
def _pointwise_kernel(x_ref, w_ref, o_ref, acc_ref):
    @pl.when(pl.program_id(2) == 0)
    def _init():
        acc_ref[...] = jnp.zeros_like(acc_ref)

    acc_ref[...] += jnp.dot(x_ref[...], w_ref[...],
                            preferred_element_type=jnp.float32)

    @pl.when(pl.program_id(2) == pl.num_programs(2) - 1)
    def _store():
        o_ref[...] = acc_ref[...].astype(o_ref.dtype)


# ----------------------------------------------------------------------------
# Helpers
# ----------------------------------------------------------------------------
def _round_up(v, m):
    return (v + m - 1) // m * m


def _pick_tile(dim, candidates):
    for c in candidates:
        if dim % c == 0:
            return c
    return candidates[-1]


# ----------------------------------------------------------------------------
# NHWC pointwise conv (the Pallas path)
# ----------------------------------------------------------------------------
def conv_point(x, w, *, compute_dtype=jnp.bfloat16):
    """1x1 pointwise conv, no bias.  x: (N, H, W, C_in), w: (C_in, C_out) -> f32 NHWC."""
    N, H, W, C_in = x.shape
    C_out = w.shape[-1]
    M = N * H * W

    # Fold batch + spatial into the matmul M dim; stream operands in bf16 (f32 accum).
    x2 = x.reshape(M, C_in).astype(compute_dtype)
    w2 = w.astype(compute_dtype)

    # Pad to (8, 128)-aligned tiles only when needed (no-op for aligned shapes).
    Mp = _round_up(M, 8)
    Kp = _round_up(C_in, 128)
    Np = _round_up(C_out, 128)
    tm = min(256, Mp)
    Mp = _round_up(Mp, tm)
    tk = _pick_tile(Kp, (512, 256, 128))
    tn = _pick_tile(Np, (512, 256, 128))

    if (Mp, Kp) != (M, C_in):
        x2 = jnp.pad(x2, ((0, Mp - M), (0, Kp - C_in)))
    if (Kp, Np) != (C_in, C_out):
        w2 = jnp.pad(w2, ((0, Kp - C_in), (0, Np - C_out)))

    grid = (Mp // tm, Np // tn, Kp // tk)

    out = pl.pallas_call(
        _pointwise_kernel,
        out_shape=jax.ShapeDtypeStruct((Mp, Np), jnp.float32),
        grid_spec=pltpu.PrefetchScalarGridSpec(
            num_scalar_prefetch=0,
            grid=grid,
            in_specs=[
                pl.BlockSpec((tm, tk), lambda i, j, k: (i, k)),   # activations
                pl.BlockSpec((tk, tn), lambda i, j, k: (k, j)),   # weights
            ],
            out_specs=pl.BlockSpec((tm, tn), lambda i, j, k: (i, j)),
            scratch_shapes=[pltpu.VMEM((tm, tn), jnp.float32)],
        ),
        compiler_params=pltpu.CompilerParams(
            dimension_semantics=("parallel", "parallel", "arbitrary")),
    )(x2, w2)

    if (Mp, Np) != (M, C_out):
        out = out[:M, :C_out]
    return out.reshape(N, H, W, C_out)


# ----------------------------------------------------------------------------
# PyTorch-semantics wrapper: NCHW input, (C_out, C_in, 1, 1) weight, bias=False
# ----------------------------------------------------------------------------
def conv_point_nchw(x, weight, *, compute_dtype=jnp.bfloat16):
    """Matches conv_point.forward: x (N, C_in, H, W), weight (C_out, C_in, 1, 1)."""
    C_out, C_in = weight.shape[0], weight.shape[1]
    w = weight.reshape(C_out, C_in).T                 # (C_in, C_out)
    x_nhwc = jnp.transpose(x, (0, 2, 3, 1))           # layout plumbing outside the kernel
    y = conv_point(x_nhwc, w, compute_dtype=compute_dtype)
    return jnp.transpose(y, (0, 3, 1, 2))


# ----------------------------------------------------------------------------
if __name__ == "__main__":
    # Small demo shapes consistent with the module (Xception-style channel counts,
    # kept modest): NCHW input, 1x1 conv 128 -> 256 channels, no bias.
    N, C_IN, H, W = 2, 128, 16, 16
    C_OUT = 256

    key = jax.random.PRNGKey(0)
    kx, kw = jax.random.split(key)
    x = jax.random.normal(kx, (N, C_IN, H, W), jnp.float32)
    # PyTorch Conv2d default init: kaiming_uniform(a=sqrt(5)) -> U(-1/sqrt(fan_in), +).
    bound = float(C_IN) ** -0.5
    weight = jax.random.uniform(kw, (C_OUT, C_IN, 1, 1), jnp.float32, -bound, bound)

    fwd = jax.jit(conv_point_nchw)
    out = jax.block_until_ready(fwd(x, weight))
    assert out.shape == (N, C_OUT, H, W), out.shape
    assert bool(jnp.all(jnp.isfinite(out)))

    # Reference with the same bf16 operand cast (kernel accumulates in f32 on the MXU),
    # so the only difference is accumulation order.
    ref = jnp.einsum("nchw,oc->nohw",
                     x.astype(jnp.bfloat16),
                     weight[:, :, 0, 0].astype(jnp.bfloat16),
                     preferred_element_type=jnp.float32)
    max_err = float(jnp.max(jnp.abs(out - ref)))
    assert max_err < 1e-2, max_err

    print("KERNEL_OK")
</pallas_src>

<mosaic_0001>
module attributes {stable_mosaic.version = 11 : i64} {
  func.func @_pointwise_kernel(%arg0: i32, %arg1: i32, %arg2: i32, %arg3: memref<256x128xbf16, #tpu.memory_space<vmem>>, %arg4: memref<128x256xbf16, #tpu.memory_space<vmem>>, %arg5: memref<256x256xf32, #tpu.memory_space<vmem>>, %arg6: memref<256x256xf32, #tpu.memory_space<vmem>>) attributes {dimension_semantics = [#tpu.dimension_semantics<parallel>, #tpu.dimension_semantics<parallel>, #tpu.dimension_semantics<arbitrary>], iteration_bounds = array<i64: 2, 1, 1>, scalar_prefetch = 0 : i64, scratch_operands = 1 : i64, tpu.core_type = #tpu.core_type<tc>, window_params = [{transform_indices = @transform_0, window_bounds = array<i64: 256, 128>}, {transform_indices = @transform_1, window_bounds = array<i64: 128, 256>}, {transform_indices = @transform_2, window_bounds = array<i64: 256, 256>}]} {
    %c0_i32 = arith.constant 0 : i32
    %0 = arith.cmpi eq, %arg2, %c0_i32 : i32
    %1 = arith.extui %0 : i1 to i32
    %c0_i32_0 = arith.constant 0 : i32
    %2 = arith.cmpi ne, %1, %c0_i32_0 : i32
    scf.if %2 {
      %cst_10 = arith.constant 0.000000e+00 : f32
      %12 = vector.broadcast %cst_10 : f32 to vector<256x256xf32>
      %c0_11 = arith.constant 0 : index
      %c0_12 = arith.constant 0 : index
      %13 = vector.load %arg6[%c0_11, %c0_12] : memref<256x256xf32, #tpu.memory_space<vmem>>, vector<256x256xf32>
      tpu.vector_store %arg6[%c0_11, %c0_12], %12 {strides = array<i32>} : memref<256x256xf32, #tpu.memory_space<vmem>>, vector<256x256xf32>,
    } else {
    }
    %c0 = arith.constant 0 : index
    %c0_1 = arith.constant 0 : index
    %3 = vector.load %arg6[%c0, %c0_1] : memref<256x256xf32, #tpu.memory_space<vmem>>, vector<256x256xf32>
    %c0_2 = arith.constant 0 : index
    %c0_3 = arith.constant 0 : index
    %4 = vector.load %arg3[%c0_2, %c0_3] : memref<256x128xbf16, #tpu.memory_space<vmem>>, vector<256x128xbf16>
    %c0_4 = arith.constant 0 : index
    %c0_5 = arith.constant 0 : index
    %5 = vector.load %arg4[%c0_4, %c0_5] : memref<128x256xbf16, #tpu.memory_space<vmem>>, vector<128x256xbf16>
    %cst = arith.constant dense<0.000000e+00> : vector<256x256xf32>
    %6 = tpu.matmul %4, %5, %cst {dimension_numbers = #tpu.dot_dimension_numbers<[1], [0], [0], [1], [0, 0, 1, 1], [], []>} : vector<256x128xbf16>, vector<128x256xbf16>, vector<256x256xf32> -> vector<256x256xf32>
    %7 = arith.addf %3, %6 : vector<256x256xf32>
    %c0_6 = arith.constant 0 : index
    %c0_7 = arith.constant 0 : index
    %8 = vector.load %arg6[%c0_6, %c0_7] : memref<256x256xf32, #tpu.memory_space<vmem>>, vector<256x256xf32>
    tpu.vector_store %arg6[%c0_6, %c0_7], %7 {strides = array<i32>} : memref<256x256xf32, #tpu.memory_space<vmem>>, vector<256x256xf32>,
    %c0_i32_8 = arith.constant 0 : i32
    %9 = arith.cmpi eq, %arg2, %c0_i32_8 : i32
    %10 = arith.extui %9 : i1 to i32
    %c0_i32_9 = arith.constant 0 : i32
    %11 = arith.cmpi ne, %10, %c0_i32_9 : i32
    scf.if %11 {
      %c0_10 = arith.constant 0 : index
      %c0_11 = arith.constant 0 : index
      %12 = vector.load %arg6[%c0_10, %c0_11] : memref<256x256xf32, #tpu.memory_space<vmem>>, vector<256x256xf32>
      %c0_12 = arith.constant 0 : index
      %c0_13 = arith.constant 0 : index
      %13 = vector.load %arg5[%c0_12, %c0_13] : memref<256x256xf32, #tpu.memory_space<vmem>>, vector<256x256xf32>
      tpu.vector_store %arg5[%c0_12, %c0_13], %12 {strides = array<i32>} : memref<256x256xf32, #tpu.memory_space<vmem>>, vector<256x256xf32>,
    } else {
    }
    return
  }
  func.func @transform_0(%arg0: i32, %arg1: i32, %arg2: i32) -> (i32, i32) {
    %c0_i32 = arith.constant 0 : i32
    return %arg0, %arg2 : i32, i32
  }
  func.func @transform_1(%arg0: i32, %arg1: i32, %arg2: i32) -> (i32, i32) {
    %c0_i32 = arith.constant 0 : i32
    return %arg2, %arg1 : i32, i32
  }
  func.func @transform_2(%arg0: i32, %arg1: i32, %arg2: i32) -> (i32, i32) {
    %c0_i32 = arith.constant 0 : i32
    return %arg0, %arg1 : i32, i32
  }
}

</mosaic_0001>

<bundles_post_ra>
// kernel: conv_point_nchw.1
= control target key start
LH: loop header
LB: loop body
LE: loop exit
PB: predicated region body
PF: predicated region fallthrough
CT: control target
= control target key end

     0   :  { %7 = vsyncpa [#allocation4], 0  ;;  %s1759_s0 = inlined_call_operand.vmem [shape: bf16[512,128], index: 0, kind: input, shape index: {}]   ;;  %s1760_s1 = inlined_call_operand.vmem [shape: bf16[128,256], index: 1, kind: input, shape index: {}]   ;;  %s1761_s2 = inlined_call_operand.hbm [shape: f32[512,256], index: 2, kind: output, shape index: {}]  }
   0x1   :  { %9 = vsyncpa [#allocation4 + $0x1], 0  ;;  %s1478_s9 = smov 0   ;;  %s1480_s10 = smov 0  }
   0x2   :  { %s1482_s11 = smov 0   ;;  %s1484_s12 = smov 0  }
   0x3   :  { %s1486_s13 = smov 0   ;;  %s1488_s14 = smov 0  }
   0x4 LB: > { %s1131_s15 = sadd.s32 4294967295, %s1459_s14   ;;  %s1132_s16 = sadd.s32 4294967294, %s1459_s14   ;;  %s1459_s14 = sphi %s1488_s14, %s15_s14   ;;  %s1455_s13 = sphi %s1486_s13, %s1768_s13   ;;  %s1451_s12 = sphi %s1484_s12, %s1767_s12   ;;  %s1447_s11 = sphi %s1482_s11, %s1766_s11   ;;  %s1443_s10 = sphi %s1480_s10, %s1765_s10   ;;  %s1439_s9 = sphi %s1478_s9, %s1764_s9  }
   0x5   : > { %s34_s17 = sadd.s32 1, %s1455_s13  ;;  %s99_s18 = sadd.s32 1, %s1447_s11 }
   0x6   : > { %p36_p0 = scmp.ge.s32.totalorder %s34_s17, 2  ;;  %p109_p1 = scmp.ne.s32.totalorder %s1447_s11, %s1443_s10 }
   0x7   : > { %p110_p2 = scmp.eq.s32.totalorder %s1131_s15, 1  ;;  %p115_p3 = scmp.ne.s32.totalorder %s1443_s10, %s1439_s9 }
   0x8   : > { %s1770_s17 = smov (%p36_p0, %s34_s17), 0  ;;  %p116_p5 = scmp.eq.s32.totalorder %s1132_s16, 1 }
   0x9   : > { %p1518_p4 = por %p110_p2, %p109_p1  ;;  %s94_s20 = ssub.s32 %s1455_s13, %s1770_s17 }
   0xa   : > { %p1136_p6 = scmp.ge.s32.totalorder %s1459_s14, 1  ;;  %p97_p7 = scmp.eq.s32.totalorder %s94_s20, 0 }
   0xb   : > { %p1525_p8 = por %p116_p5, %p115_p3  ;;  %p161_p9 = scmp.lt.s32.totalorder %s1459_s14, 3 }
   0xc   : > { %s1531_s22 = scalar_select %p97_p7, %s1447_s11, %s99_s18  }
   0xd   : > { %p162_p10 = pnand %p1136_p6, %p161_p9 }
   0xe   : > { %s1138_s27 = sshll.u32 (!%p162_p10), %s1451_s12, 5  ;;  %s1307_s23 = sshll.u32 (!%p162_p10), %s1451_s12, 9 }
   0xf   : > { %165 = sbr.rel (%p162_p10) target bundleno = 311 (0x137), region = 28  ;;  %p197_p11 = scmp.lt.s32.totalorder (!%p162_p10), %s1138_s27, 63 }
  0x10   : > { %s1027_s26 = scalar_lea.hbm (!%p162_p10), %s1761_s2, %s1307_s23  ;;  %s1401_s6 = scalar_lea.hbm (!%p162_p10), %s1761_s2, 1024 }
  0x11   : > { %s1030_s29 = sshll.u32 (!%p162_p10), %s1027_s26, 4  ;;  %s1031_s29 = int_to_ptr.hbm [resolvable:$true] %s1030_s29 }
  0x12   : > { %s1395_s30 = sshra.s32 (!%p162_p10), %s1031_s29, 4  ;;  %s1396_s30 = int_to_ptr.hbm [resolvable:$true] %s1395_s30 }
  0x13   : > { %p1402_p1 = scmp.lt.s32.totalorder (!%p162_p10), %s1396_s30, %s1761_s2 }
  0x14   : > { %v1262_v0 = vld [vmem:[%s1760_s1 + $0x70] sm:$0xf]  ;;  %v1305_v1 = vld [vmem:[%s1760_s1 + $0x74] sm:$0xf0]  ;;  %v1304_v2 = vld [vmem:[%s1760_s1 + $0x74] sm:$0xf] }
  0x15   : > { %v1263_v3 = vor.u32 %v1305_v1, %v1262_v0  ;;  %v1264_v4 = vld [vmem:[%s1760_s1 + $0x78] sm:$0xf0]  ;;  %v1254_v5 = vld [vmem:[%s1760_s1 + $0x60] sm:$0xf]  ;;  %v1303_v6 = vld [vmem:[%s1760_s1 + $0x64] sm:$0xf0] }
  0x16   : > { %v1267_v7 = vor.u32 %v1304_v2, %v1264_v4  ;;  %v1302_v8 = vld [vmem:[%s1760_s1 + $0x64] sm:$0xf]  ;;  %v1256_v9 = vld [vmem:[%s1760_s1 + $0x68] sm:$0xf0]  ;;  %v1255_v10 = vor.u32 %v1303_v6, %v1254_v5  ;;  %v1246_v12 = vld [vmem:[%s1760_s1 + $0x50] sm:$0xf] }
  0x17   : > { %575 = vmatpush.bf16.msra.mxu0 %v1263_v3  ;;  %1308 = vmatpush.bf16.msra.mxu2 %v1263_v3  ;;  %v1259_v11 = vor.u32 %v1302_v8, %v1256_v9  ;;  %v1301_v13 = vld [vmem:[%s1760_s1 + $0x54] sm:$0xf0]  ;;  %v1300_v14 = vld [vmem:[%s1760_s1 + $0x54] sm:$0xf]  ;;  %v1248_v15 = vld [vmem:[%s1760_s1 + $0x58] sm:$0xf0] }
  0x18   : > { %664 = vmatpush.bf16.msra.mxu1 %v1267_v7  ;;  %1316 = vmatpush.bf16.msra.mxu3 %v1267_v7  ;;  %v1247_v16 = vor.u32 %v1301_v13, %v1246_v12  ;;  %v1251_v17 = vor.u32 %v1300_v14, %v1248_v15  ;;  %v1238_v18 = vld [vmem:[%s1760_s1 + $0x40] sm:$0xf]  ;;  %v1299_v19 = vld [vmem:[%s1760_s1 + $0x44] sm:$0xf0]  ;;  %v1298_v20 = vld [vmem:[%s1760_s1 + $0x44] sm:$0xf] }
  0x19   : > { %v1240_v21 = vld [vmem:[%s1760_s1 + $0x48] sm:$0xf0]  ;;  %v1239_v22 = vor.u32 %v1299_v19, %v1238_v18  ;;  %v1230_v24 = vld [vmem:[%s1760_s1 + $0x30] sm:$0xf]  ;;  %v1297_v25 = vld [vmem:[%s1760_s1 + $0x34] sm:$0xf0] }
  0x1a   : > { %v1243_v23 = vor.u32 %v1298_v20, %v1240_v21  ;;  %v1296_v26 = vld [vmem:[%s1760_s1 + $0x34] sm:$0xf]  ;;  %v1232_v27 = vld [vmem:[%s1760_s1 + $0x38] sm:$0xf0]  ;;  %v1231_v28 = vor.u32 %v1297_v25, %v1230_v24  ;;  %v1222_v30 = vld [vmem:[%s1760_s1 + $0x20] sm:$0xf] }
  0x1b   : > { %576 = vmatpush.bf16.msra.mxu0 %v1255_v10  ;;  %1309 = vmatpush.bf16.msra.mxu2 %v1255_v10  ;;  %v1235_v29 = vor.u32 %v1296_v26, %v1232_v27  ;;  %v1295_v31 = vld [vmem:[%s1760_s1 + $0x24] sm:$0xf0]  ;;  %v1294_v32 = vld [vmem:[%s1760_s1 + $0x24] sm:$0xf]  ;;  %v1224_v33 = vld [vmem:[%s1760_s1 + $0x28] sm:$0xf0] }
  0x1c   : > { %665 = vmatpush.bf16.msra.mxu1 %v1259_v11  ;;  %1317 = vmatpush.bf16.msra.mxu3 %v1259_v11  ;;  %v1223_v34 = vor.u32 %v1295_v31, %v1222_v30  ;;  %v1227_v35 = vor.u32 %v1294_v32, %v1224_v33  ;;  %v1214_v36 = vld [vmem:[%s1760_s1 + $0x10] sm:$0xf]  ;;  %v1293_v37 = vld [vmem:[%s1760_s1 + $0x14] sm:$0xf0]  ;;  %s1772_s27 = smov (!%p197_p11, %s1138_s27), 63 }
  0x1d   : > { %v1292_v38 = vld [vmem:[%s1760_s1 + $0x14] sm:$0xf]  ;;  %v1216_v39 = vld [vmem:[%s1760_s1 + $0x18] sm:$0xf0]  ;;  %v1215_v40 = vor.u32 %v1293_v37, %v1214_v36  ;;  %v1206_v42 = vld [vmem:[%s1760_s1] sm:$0xf] }
  0x1e   : > { %v1219_v41 = vor.u32 %v1292_v38, %v1216_v39  ;;  %v1291_v43 = vld [vmem:[%s1760_s1 + $0x4] sm:$0xf0]  ;;  %s1139_s3 = sshll.u32 %s1772_s27, 2  ;;  %v1290_v44 = vld [vmem:[%s1760_s1 + $0x4] sm:$0xf]  ;;  %s193_s27 = sand.u32 1, %s1443_s10  }
  0x1f   : > { %577 = vmatpush.bf16.msra.mxu0 %v1247_v16  ;;  %1310 = vmatpush.bf16.msra.mxu2 %v1247_v16  ;;  %v1208_v45 = vld [vmem:[%s1760_s1 + $0x8] sm:$0xf0]  ;;  %v1207_v46 = vor.u32 %v1291_v43, %v1206_v42  ;;  %s1633_s16 = scalar_lea.vmem %s1759_s0, %s1139_s3  ;;  %s1137_s18 = sshll.u32 %s193_s27, 9 }
  0x20   : > { %666 = vmatpush.bf16.msra.mxu1 %v1251_v17  ;;  %1318 = vmatpush.bf16.msra.mxu3 %v1251_v17  ;;  %v1211_v47 = vor.u32 %v1290_v44, %v1208_v45  ;;  %v1274_v48 = vld [vmem:[%s1633_s16] sm:$0xff]  ;;  %v1275_v50 = vld [vmem:[%s1633_s16 + $0x8] sm:$0xff]  ;;  %v1276_v52 = vld [vmem:[%s1633_s16 + $0x10] sm:$0xff]  ;;  %s1654_s20 = scalar_lea.vmem [#allocation3], %s1137_s18  ;;  %s1013_s12 = scalar_lea.sflag [#allocation4], %s193_s27 }
  0x21   : > { %v1282_v49 = vld [vmem:[%s1633_s16 + $0x40] sm:$0xff]  ;;  %v1283_v51 = vld [vmem:[%s1633_s16 + $0x48] sm:$0xff]  ;;  %v1284_v53 = vld [vmem:[%s1633_s16 + $0x50] sm:$0xff]  ;;  %s1028_s28 = sshll.u32 %s1654_s20, 4  ;;  %s1397_s3 = scalar_lea.hbm %s1396_s30, 512  ;;  %s1029_s28 = int_to_ptr.vmem [resolvable:$true] %s1028_s28 }
  0x22   : > { %v1277_v54 = vld [vmem:[%s1633_s16 + $0x18] sm:$0xff]  ;;  %v1278_v56 = vld [vmem:[%s1633_s16 + $0x20] sm:$0xff]  ;;  %v1279_v58 = vld [vmem:[%s1633_s16 + $0x28] sm:$0xff]  ;;  %p1398_p12 = scmp.ne.s32.totalorder %s1396_s30, %s1397_s3  ;;  %p1403_p2 = scmp.lt.s32.totalorder %s1401_s6, %s1397_s3 }
  0x23   : > { %578 = vmatpush.bf16.msra.mxu0 %v1239_v22  ;;  %1311 = vmatpush.bf16.msra.mxu2 %v1239_v22  ;;  %v1285_v55 = vld [vmem:[%s1633_s16 + $0x58] sm:$0xff]  ;;  %v1286_v57 = vld [vmem:[%s1633_s16 + $0x60] sm:$0xff]  ;;  %v1287_v59 = vld [vmem:[%s1633_s16 + $0x68] sm:$0xff] }
  0x24   : > { %667 = vmatpush.bf16.msra.mxu1 %v1243_v23  ;;  %1319 = vmatpush.bf16.msra.mxu3 %v1243_v23  ;;  %v1280_v60 = vld [vmem:[%s1633_s16 + $0x30] sm:$0xff]  ;;  %v1281_v62 = vld [vmem:[%s1633_s16 + $0x38] sm:$0xff]  ;;  %p1399_p13 = pnand %p1398_p12, %p1518_p4  ;;  %p1404_p3 = por %p1403_p2, %p1402_p1 }
  0x25   : > { %v1288_v61 = vld [vmem:[%s1633_s16 + $0x70] sm:$0xff]  ;;  %v1289_v63 = vld [vmem:[%s1633_s16 + $0x78] sm:$0xff] }
  0x26   : > { %p1400_p0 = pneg %p1399_p13 }
  0x27   : > { %579 = vmatpush.bf16.msra.mxu0 %v1231_v28  ;;  %1312 = vmatpush.bf16.msra.mxu2 %v1231_v28 }
  0x28   : > { %668 = vmatpush.bf16.msra.mxu1 %v1235_v29  ;;  %1320 = vmatpush.bf16.msra.mxu3 %v1235_v29  ;;  %p1405_p5 = pnand %p1404_p3, %p1400_p0 }
  0x2b   : > { %580 = vmatpush.bf16.msra.mxu0 %v1223_v34  ;;  %1313 = vmatpush.bf16.msra.mxu2 %v1223_v34 }
  0x2c   : > { %669 = vmatpush.bf16.msra.mxu1 %v1227_v35  ;;  %1321 = vmatpush.bf16.msra.mxu3 %v1227_v35 }
  0x2f   : > { %581 = vmatpush.bf16.msra.mxu0 %v1215_v40  ;;  %1314 = vmatpush.bf16.msra.mxu2 %v1215_v40 }
  0x30   : > { %670 = vmatpush.bf16.msra.mxu1 %v1219_v41  ;;  %1322 = vmatpush.bf16.msra.mxu3 %v1219_v41 }
  0x33   : > { %582 = vmatpush.bf16.msra.mxu0 %v1207_v46  ;;  %1315 = vmatpush.bf16.msra.mxu2 %v1207_v46 }
  0x34   : > { %671 = vmatpush.bf16.msra.mxu1 %v1211_v47  ;;  %1323 = vmatpush.bf16.msra.mxu3 %v1211_v47 }
  0x36   : > { %583 = vmatmul.bf16.vlgmr.msra.gmra.mxu0 %v1274_v48  ;;  %623 = vmatmul.bf16.vlgmr.msra.gmra.mxu2 %v1282_v49 }
  0x37   : > { %672 = vmatmul.bf16.vlgmr.msra.gmra.mxu1 %v1274_v48  ;;  %712 = vmatmul.bf16.vlgmr.msra.gmra.mxu3 %v1282_v49 }
  0x46   : > { %588 = vmatmul.bf16.gmra.mxu0 %v1275_v50  ;;  %628 = vmatmul.bf16.gmra.mxu2 %v1283_v51 }
  0x47   : > { %677 = vmatmul.bf16.gmra.mxu1 %v1275_v50  ;;  %717 = vmatmul.bf16.gmra.mxu3 %v1283_v51 }
  0x56   : > { %593 = vmatmul.bf16.gmra.mxu0 %v1276_v52  ;;  %633 = vmatmul.bf16.gmra.mxu2 %v1284_v53 }
  0x57   : > { %682 = vmatmul.bf16.gmra.mxu1 %v1276_v52  ;;  %722 = vmatmul.bf16.gmra.mxu3 %v1284_v53 }
  0x66   : > { %598 = vmatmul.bf16.gmra.mxu0 %v1277_v54  ;;  %638 = vmatmul.bf16.gmra.mxu2 %v1285_v55 }
  0x67   : > { %687 = vmatmul.bf16.gmra.mxu1 %v1277_v54  ;;  %727 = vmatmul.bf16.gmra.mxu3 %v1285_v55 }
  0x76   : > { %603 = vmatmul.bf16.gmra.mxu0 %v1278_v56  ;;  %643 = vmatmul.bf16.gmra.mxu2 %v1286_v57 }
  0x77   : > { %692 = vmatmul.bf16.gmra.mxu1 %v1278_v56  ;;  %732 = vmatmul.bf16.gmra.mxu3 %v1286_v57 }
  0x86   : > { %608 = vmatmul.bf16.gmra.mxu0 %v1279_v58  ;;  %648 = vmatmul.bf16.gmra.mxu2 %v1287_v59 }
  0x87   : > { %697 = vmatmul.bf16.gmra.mxu1 %v1279_v58  ;;  %737 = vmatmul.bf16.gmra.mxu3 %v1287_v59 }
  0x96   : > { %613 = vmatmul.bf16.gmra.mxu0 %v1280_v60  ;;  %653 = vmatmul.bf16.gmra.mxu2 %v1288_v61 }
  0x97   : > { %702 = vmatmul.bf16.gmra.mxu1 %v1280_v60  ;;  %742 = vmatmul.bf16.gmra.mxu3 %v1288_v61 }
  0xa6   : > { %618 = vmatmul.bf16.gmra.mxu0 %v1281_v62  ;;  %658 = vmatmul.bf16.gmra.mxu2 %v1289_v63 }
  0xa7   : > { %707 = vmatmul.bf16.gmra.mxu1 %v1281_v62  ;;  %747 = vmatmul.bf16.gmra.mxu3 %v1289_v63 }
  0xb3   : > { %v584_v0 = vpop.f32.mrf.mxu0 }
  0xb4   : > { %948 = vst [vmem:[%s1654_s20] sm:$0xff] %v584_v0  ;;  %v673_v1 = vpop.f32.mrf.mxu1 }
  0xb5   : > { %949 = vst [vmem:[%s1654_s20 + $0x8] sm:$0xff] %v673_v1 }
  0xb9   : > { %v624_v2 = vpop.f32.mrf.mxu2 }
  0xba   : > { %980 = vst [vmem:[%s1654_s20 + $0x100] sm:$0xff] %v624_v2  ;;  %v713_v3 = vpop.f32.mrf.mxu3 }
  0xbb   : > { %981 = vst [vmem:[%s1654_s20 + $0x108] sm:$0xff] %v713_v3  ;;  %v586_v4 = vpop.f32.mrf.mxu0 }
  0xbc   : > { %950 = vst [vmem:[%s1654_s20 + $0x10] sm:$0xff] %v586_v4  ;;  %v675_v5 = vpop.f32.mrf.mxu1 }
  0xbd   : > { %951 = vst [vmem:[%s1654_s20 + $0x18] sm:$0xff] %v675_v5 }
  0xc1   : > { %v626_v6 = vpop.f32.mrf.mxu2 }
  0xc2   : > { %982 = vst [vmem:[%s1654_s20 + $0x110] sm:$0xff] %v626_v6  ;;  %v715_v7 = vpop.f32.mrf.mxu3 }
  0xc3   : > { %983 = vst [vmem:[%s1654_s20 + $0x118] sm:$0xff] %v715_v7  ;;  %v589_v8 = vpop.f32.mrf.mxu0 }
  0xc4   : > { %952 = vst [vmem:[%s1654_s20 + $0x20] sm:$0xff] %v589_v8  ;;  %v678_v9 = vpop.f32.mrf.mxu1 }
  0xc5   : > { %953 = vst [vmem:[%s1654_s20 + $0x28] sm:$0xff] %v678_v9 }
  0xc9   : > { %v629_v10 = vpop.f32.mrf.mxu2 }
  0xca   : > { %984 = vst [vmem:[%s1654_s20 + $0x120] sm:$0xff] %v629_v10  ;;  %v718_v11 = vpop.f32.mrf.mxu3 }
  0xcb   : > { %985 = vst [vmem:[%s1654_s20 + $0x128] sm:$0xff] %v718_v11  ;;  %v591_v12 = vpop.f32.mrf.mxu0 }
  0xcc   : > { %954 = vst [vmem:[%s1654_s20 + $0x30] sm:$0xff] %v591_v12  ;;  %v680_v13 = vpop.f32.mrf.mxu1 }
  0xcd   : > { %955 = vst [vmem:[%s1654_s20 + $0x38] sm:$0xff] %v680_v13 }
  0xd1   : > { %v631_v14 = vpop.f32.mrf.mxu2 }
  0xd2   : > { %986 = vst [vmem:[%s1654_s20 + $0x130] sm:$0xff] %v631_v14  ;;  %v720_v15 = vpop.f32.mrf.mxu3 }
  0xd3   : > { %987 = vst [vmem:[%s1654_s20 + $0x138] sm:$0xff] %v720_v15  ;;  %v594_v16 = vpop.f32.mrf.mxu0 }
  0xd4   : > { %956 = vst [vmem:[%s1654_s20 + $0x40] sm:$0xff] %v594_v16  ;;  %v683_v17 = vpop.f32.mrf.mxu1 }
  0xd5   : > { %957 = vst [vmem:[%s1654_s20 + $0x48] sm:$0xff] %v683_v17 }
  0xd9   : > { %v634_v18 = vpop.f32.mrf.mxu2 }
  0xda   : > { %988 = vst [vmem:[%s1654_s20 + $0x140] sm:$0xff] %v634_v18  ;;  %v723_v19 = vpop.f32.mrf.mxu3 }
  0xdb   : > { %989 = vst [vmem:[%s1654_s20 + $0x148] sm:$0xff] %v723_v19  ;;  %v596_v20 = vpop.f32.mrf.mxu0 }
  0xdc   : > { %958 = vst [vmem:[%s1654_s20 + $0x50] sm:$0xff] %v596_v20  ;;  %v685_v21 = vpop.f32.mrf.mxu1 }
  0xdd   : > { %959 = vst [vmem:[%s1654_s20 + $0x58] sm:$0xff] %v685_v21 }
  0xe1   : > { %v636_v22 = vpop.f32.mrf.mxu2 }
  0xe2   : > { %990 = vst [vmem:[%s1654_s20 + $0x150] sm:$0xff] %v636_v22  ;;  %v725_v23 = vpop.f32.mrf.mxu3 }
  0xe3   : > { %991 = vst [vmem:[%s1654_s20 + $0x158] sm:$0xff] %v725_v23  ;;  %v599_v24 = vpop.f32.mrf.mxu0 }
  0xe4   : > { %960 = vst [vmem:[%s1654_s20 + $0x60] sm:$0xff] %v599_v24  ;;  %v688_v25 = vpop.f32.mrf.mxu1 }
  0xe5   : > { %961 = vst [vmem:[%s1654_s20 + $0x68] sm:$0xff] %v688_v25 }
  0xe9   : > { %v639_v26 = vpop.f32.mrf.mxu2 }
  0xea   : > { %992 = vst [vmem:[%s1654_s20 + $0x160] sm:$0xff] %v639_v26  ;;  %v728_v27 = vpop.f32.mrf.mxu3 }
  0xeb   : > { %993 = vst [vmem:[%s1654_s20 + $0x168] sm:$0xff] %v728_v27  ;;  %v601_v28 = vpop.f32.mrf.mxu0 }
  0xec   : > { %962 = vst [vmem:[%s1654_s20 + $0x70] sm:$0xff] %v601_v28  ;;  %v690_v29 = vpop.f32.mrf.mxu1 }
  0xed   : > { %963 = vst [vmem:[%s1654_s20 + $0x78] sm:$0xff] %v690_v29 }
  0xf1   : > { %v641_v30 = vpop.f32.mrf.mxu2 }
  0xf2   : > { %994 = vst [vmem:[%s1654_s20 + $0x170] sm:$0xff] %v641_v30  ;;  %v730_v31 = vpop.f32.mrf.mxu3 }
  0xf3   : > { %995 = vst [vmem:[%s1654_s20 + $0x178] sm:$0xff] %v730_v31  ;;  %v604_v32 = vpop.f32.mrf.mxu0 }
  0xf4   : > { %964 = vst [vmem:[%s1654_s20 + $0x80] sm:$0xff] %v604_v32  ;;  %v693_v33 = vpop.f32.mrf.mxu1 }
  0xf5   : > { %965 = vst [vmem:[%s1654_s20 + $0x88] sm:$0xff] %v693_v33 }
  0xf9   : > { %v644_v34 = vpop.f32.mrf.mxu2 }
  0xfa   : > { %996 = vst [vmem:[%s1654_s20 + $0x180] sm:$0xff] %v644_v34  ;;  %v733_v35 = vpop.f32.mrf.mxu3 }
  0xfb   : > { %997 = vst [vmem:[%s1654_s20 + $0x188] sm:$0xff] %v733_v35  ;;  %v606_v36 = vpop.f32.mrf.mxu0 }
  0xfc   : > { %966 = vst [vmem:[%s1654_s20 + $0x90] sm:$0xff] %v606_v36  ;;  %v695_v37 = vpop.f32.mrf.mxu1 }
  0xfd   : > { %967 = vst [vmem:[%s1654_s20 + $0x98] sm:$0xff] %v695_v37 }
 0x101   : > { %v646_v38 = vpop.f32.mrf.mxu2 }
 0x102   : > { %998 = vst [vmem:[%s1654_s20 + $0x190] sm:$0xff] %v646_v38  ;;  %v735_v39 = vpop.f32.mrf.mxu3 }
 0x103   : > { %999 = vst [vmem:[%s1654_s20 + $0x198] sm:$0xff] %v735_v39  ;;  %v609_v40 = vpop.f32.mrf.mxu0 }
 0x104   : > { %968 = vst [vmem:[%s1654_s20 + $0xa0] sm:$0xff] %v609_v40  ;;  %v698_v41 = vpop.f32.mrf.mxu1 }
 0x105   : > { %969 = vst [vmem:[%s1654_s20 + $0xa8] sm:$0xff] %v698_v41 }
 0x109   : > { %v649_v42 = vpop.f32.mrf.mxu2 }
 0x10a   : > { %1000 = vst [vmem:[%s1654_s20 + $0x1a0] sm:$0xff] %v649_v42  ;;  %v738_v43 = vpop.f32.mrf.mxu3 }
 0x10b   : > { %1001 = vst [vmem:[%s1654_s20 + $0x1a8] sm:$0xff] %v738_v43  ;;  %v611_v44 = vpop.f32.mrf.mxu0 }
 0x10c   : > { %970 = vst [vmem:[%s1654_s20 + $0xb0] sm:$0xff] %v611_v44  ;;  %v700_v45 = vpop.f32.mrf.mxu1 }
 0x10d   : > { %971 = vst [vmem:[%s1654_s20 + $0xb8] sm:$0xff] %v700_v45 }
 0x111   : > { %v651_v46 = vpop.f32.mrf.mxu2 }
 0x112   : > { %1002 = vst [vmem:[%s1654_s20 + $0x1b0] sm:$0xff] %v651_v46  ;;  %v740_v47 = vpop.f32.mrf.mxu3 }
 0x113   : > { %1003 = vst [vmem:[%s1654_s20 + $0x1b8] sm:$0xff] %v740_v47  ;;  %v614_v48 = vpop.f32.mrf.mxu0 }
 0x114   : > { %972 = vst [vmem:[%s1654_s20 + $0xc0] sm:$0xff] %v614_v48  ;;  %v703_v49 = vpop.f32.mrf.mxu1 }
 0x115   : > { %973 = vst [vmem:[%s1654_s20 + $0xc8] sm:$0xff] %v703_v49 }
 0x119   : > { %v654_v50 = vpop.f32.mrf.mxu2 }
 0x11a   : > { %1004 = vst [vmem:[%s1654_s20 + $0x1c0] sm:$0xff] %v654_v50  ;;  %v743_v51 = vpop.f32.mrf.mxu3 }
 0x11b   : > { %1005 = vst [vmem:[%s1654_s20 + $0x1c8] sm:$0xff] %v743_v51  ;;  %v616_v52 = vpop.f32.mrf.mxu0 }
 0x11c   : > { %974 = vst [vmem:[%s1654_s20 + $0xd0] sm:$0xff] %v616_v52  ;;  %v705_v53 = vpop.f32.mrf.mxu1 }
 0x11d   : > { %975 = vst [vmem:[%s1654_s20 + $0xd8] sm:$0xff] %v705_v53 }
 0x121   : > { %v656_v54 = vpop.f32.mrf.mxu2 }
 0x122   : > { %1006 = vst [vmem:[%s1654_s20 + $0x1d0] sm:$0xff] %v656_v54  ;;  %v745_v55 = vpop.f32.mrf.mxu3 }
 0x123   : > { %1007 = vst [vmem:[%s1654_s20 + $0x1d8] sm:$0xff] %v745_v55  ;;  %v619_v56 = vpop.f32.mrf.mxu0 }
 0x124   : > { %976 = vst [vmem:[%s1654_s20 + $0xe0] sm:$0xff] %v619_v56  ;;  %v708_v57 = vpop.f32.mrf.mxu1 }
 0x125   : > { %977 = vst [vmem:[%s1654_s20 + $0xe8] sm:$0xff] %v708_v57 }
 0x129   : > { %v659_v58 = vpop.f32.mrf.mxu2 }
 0x12a   : > { %1008 = vst [vmem:[%s1654_s20 + $0x1e0] sm:$0xff] %v659_v58  ;;  %v748_v59 = vpop.f32.mrf.mxu3 }
 0x12b   : > { %1009 = vst [vmem:[%s1654_s20 + $0x1e8] sm:$0xff] %v748_v59  ;;  %v621_v60 = vpop.f32.mrf.mxu0 }
 0x12c   : > { %978 = vst [vmem:[%s1654_s20 + $0xf0] sm:$0xff] %v621_v60  ;;  %v710_v61 = vpop.f32.mrf.mxu1 }
 0x12d   : > { %979 = vst [vmem:[%s1654_s20 + $0xf8] sm:$0xff] %v710_v61 }
 0x131   : > { %v661_v62 = vpop.f32.mrf.mxu2 }
 0x132   : > { %1010 = vst [vmem:[%s1654_s20 + $0x1f0] sm:$0xff] %v661_v62  ;;  %v750_v63 = vpop.f32.mrf.mxu3 }
 0x133   : > { %1011 = vst [vmem:[%s1654_s20 + $0x1f8] sm:$0xff] %v750_v63 }
 0x134   : > { %1408 = shalt.err (!%p1405_p5)
}
 0x135   : > { %s1461_s15 = smov 256   ;;  %s1462_s16 = smov 16  }
 0x136   : > { %1324 = dma.vmem_to_hbm [thread:$0]  (%p1518_p4), %s1029_s28, 8192, %s1031_s29, %s1013_s12, %s1461_s15, %s1461_s15, %s1462_s16  }
 0x137 PF: > { %p1330_p6 = scmp.ge.s32.totalorder %s1459_s14, 2  ;;  %s1045_s27 = sand.u32 1, %s1439_s9  }
 0x138   : > { %s1046_s18 = scalar_lea.sflag [#allocation4], %s1045_s27 }
 0x139   : > { %p1327_p7 = pnand %p1330_p6, %p1525_p8 }
 0x13b   : > { %p1328_p9 = pneg %p1327_p7 }
 0x13d   : > { %1434 = dma.done.wait (%p1328_p9), %s1046_s18, 8192  }
 0x13e   : > { %1436 = vsyncadd (%p1328_p9), %s1046_s18, 4294959104  ;;  %s15_s14 = sadd.s32 1, %s1459_s14   ;;  %s1764_s9 = smov %s1443_s10 }
 0x13f   : > { %p12_p10 = scmp.ge.s32.totalorder %s15_s14, 4   ;;  %s1765_s10 = smov %s1447_s11 }
 0x140   : > { %s1766_s11 = smov %s1531_s22  ;;  %s1767_s12 = smov %s1455_s13 }
 0x141   : > { %s1768_s13 = smov %s1770_s17  ;;  %14 = sbr.rel (!%p12_p10) target bundleno = 4 (0x4), region = 74 }
 0x146   :  { %1052 = vsyncpa [#allocation4], 1 }
 0x147   :  { %1054 = vsyncpa [#allocation4 + $0x1], 1 }

</bundles_post_ra>
